<compile_context>
chip_gen: v5e
topology: v5e:2x2
jax: 0.10.0
libtpu: 0.0.40
codegen_flags: <defaults>
</compile_context>

<pallas_src>
import itertools
import math

import jax
import jax.numpy as jnp
from jax.experimental import pallas as pl
from jax.experimental.pallas import tpu as pltpu

_MAX_DMA_CHUNKS = 8          # max concurrent DMAs for large arrays
_MIN_CHUNK_BYTES = 4 << 20   # don't bother chunking below ~4 MiB per DMA


def _resolve_size(size, total):
    """Resolve a torch-style size tuple (may contain a single -1)."""
    if isinstance(size, int):
        size = (size,)
    size = tuple(int(s) for s in size)
    if -1 in size:
        idx = size.index(-1)
        known = math.prod(s for s in size if s != -1)
        assert known != 0 and total % known == 0, "cannot infer -1 dimension"
        size = size[:idx] + (total // known,) + size[idx + 1:]
    assert math.prod(size) == total, "view size incompatible with tensor"
    return size


def _make_dma_copy_kernel(chunks, leading):
    """Build an HBM->HBM identity-copy kernel, chunked along the leading dim."""
    whole = len(chunks) == 1 and chunks[0] == (0, leading)

    def kernel(x_hbm, o_hbm, sem):
        copies = []
        for idx, (start, size) in enumerate(chunks):
            src = x_hbm if whole else x_hbm.at[pl.ds(start, size)]
            dst = o_hbm if whole else o_hbm.at[pl.ds(start, size)]
            copies.append(pltpu.make_async_copy(src, dst, sem.at[idx]))
        for cp in copies:      # issue every DMA before waiting on any
            cp.start()
        for cp in copies:
            cp.wait()

    return kernel


def _pallas_materialized_copy(tensor):
    """Materialize an identity copy of `tensor` via direct HBM->HBM DMA."""
    shape = tensor.shape
    total = math.prod(shape)
    itemsize = jnp.dtype(tensor.dtype).itemsize
    total_bytes = total * itemsize

    # Split large arrays into a few leading-dim chunks so several DMAs are in
    # flight concurrently; tiny arrays get a single whole-array DMA.
    leading = shape[0]
    n_chunks = max(1, min(leading, _MAX_DMA_CHUNKS,
                          total_bytes // _MIN_CHUNK_BYTES))
    base, rem = divmod(leading, n_chunks)
    sizes = [base + 1] * rem + [base] * (n_chunks - rem)
    starts = list(itertools.accumulate([0] + sizes[:-1]))
    chunks = tuple(zip(starts, sizes))

    return pl.pallas_call(
        _make_dma_copy_kernel(chunks, leading),
        out_shape=jax.ShapeDtypeStruct(shape, tensor.dtype),
        in_specs=[pl.BlockSpec(memory_space=pl.ANY)],
        out_specs=pl.BlockSpec(memory_space=pl.ANY),
        scratch_shapes=[pltpu.SemaphoreType.DMA((n_chunks,))],
        cost_estimate=pl.CostEstimate(
            flops=0, transcendentals=0, bytes_accessed=2 * total_bytes),
    )(tensor)


def view(tensor, size, *, use_pallas=True):
    """Pallas-backed equivalent of torch.Tensor.view(size)."""
    total = math.prod(tensor.shape)
    out_size = _resolve_size(size, total)

    itemsize = jnp.dtype(tensor.dtype).itemsize
    pallas_ok = (use_pallas and total > 0 and tensor.ndim >= 1
                 and tensor.dtype != jnp.bool_ and itemsize <= 4)
    if not pallas_ok:
        # TODO(synk): bool / 0-d / 8-byte dtypes use the metadata-only reshape.
        return tensor.reshape(out_size)

    copied = _pallas_materialized_copy(tensor)
    # Metadata-only reshape to the requested view size (torch .view semantics).
    return copied.reshape(out_size)


class View:
    """JAX/Pallas mirror of the PyTorch View module (no parameters)."""

    def __init__(self, size, use_pallas=True):
        self.size = size
        self.use_pallas = use_pallas

    def __call__(self, tensor):
        return view(tensor, self.size, use_pallas=self.use_pallas)


if __name__ == "__main__":
    key = jax.random.PRNGKey(0)

    # Input: NCHW-like tensor (batch=2, channels=4, spatial=16x16)
    x = jax.random.normal(key, (2, 4, 16, 16), dtype=jnp.float32)
    mod = View((2, -1))
    y = jax.block_until_ready(mod(x))
    ref = x.reshape(2, -1)
    assert y.shape == (2, 1024), y.shape
    assert y.dtype == x.dtype
    assert bool(jnp.array_equal(y, ref))

    # Odd element count + narrow dtype through the same DMA kernel (no padding,
    # no bitcast packing).
    xb = (jax.random.normal(key, (3, 5, 7)) * 8.0).astype(jnp.bfloat16)
    yb = jax.block_until_ready(View((-1,))(xb))
    assert yb.shape == (105,)
    assert bool(jnp.array_equal(yb, xb.reshape(-1)))

    # int8 path (native dtype, no packing).
    xi = jax.random.randint(key, (4, 8, 32), -128, 127).astype(jnp.int8)
    yi = jax.block_until_ready(View((8, -1))(xi))
    assert yi.shape == (8, 128)
    assert bool(jnp.array_equal(yi, xi.reshape(8, -1)))

    print("KERNEL_OK")
</pallas_src>

<mosaic_0001>
module attributes {stable_mosaic.version = 11 : i64} {
  func.func @kernel(%arg0: memref<2x4x16x16xf32, #tpu.memory_space<any>>, %arg1: memref<2x4x16x16xf32, #tpu.memory_space<any>>, %arg2: memref<1x!tpu.dma_semaphore, #tpu.memory_space<semaphore_mem>>) attributes {dimension_semantics = [], scalar_prefetch = 0 : i64, scratch_operands = 1 : i64, tpu.core_type = #tpu.core_type<tc>} {
    %c0_i32 = arith.constant 0 : i32
    %0 = tpu.memref_slice %arg2[%c0_i32] : memref<1x!tpu.dma_semaphore, #tpu.memory_space<semaphore_mem>> -> memref<1x!tpu.dma_semaphore, #tpu.memory_space<semaphore_mem>>
    %1 = tpu.memref_squeeze %0 : memref<1x!tpu.dma_semaphore, #tpu.memory_space<semaphore_mem>> -> memref<!tpu.dma_semaphore, #tpu.memory_space<semaphore_mem>>
    tpu.enqueue_dma source(%arg0 : memref<2x4x16x16xf32, #tpu.memory_space<any>>) target(%arg1 : memref<2x4x16x16xf32, #tpu.memory_space<any>>) target_semaphore(%1 : memref<!tpu.dma_semaphore, #tpu.memory_space<semaphore_mem>>)
    %c0_i32_0 = arith.constant 0 : i32
    %2 = tpu.memref_slice %arg2[%c0_i32_0] : memref<1x!tpu.dma_semaphore, #tpu.memory_space<semaphore_mem>> -> memref<1x!tpu.dma_semaphore, #tpu.memory_space<semaphore_mem>>
    %3 = tpu.memref_squeeze %2 : memref<1x!tpu.dma_semaphore, #tpu.memory_space<semaphore_mem>> -> memref<!tpu.dma_semaphore, #tpu.memory_space<semaphore_mem>>
    tpu.wait_dma2 semaphore(%3 : memref<!tpu.dma_semaphore, #tpu.memory_space<semaphore_mem>>) src(%arg0 : memref<2x4x16x16xf32, #tpu.memory_space<any>>) dst(%arg1 : memref<2x4x16x16xf32, #tpu.memory_space<any>>)
    return
  }
}

</mosaic_0001>

<bundles_post_ra>
// kernel: tpu_custom_call.1
= control target key start
LH: loop header
LB: loop body
LE: loop exit
PB: predicated region body
PF: predicated region fallthrough
CT: control target
= control target key end

     0   :  { %s34_s12 = smov [#allocation2]   ;;  %s35_s13 = smov [#allocation3]   ;;  %s53_s0 = inlined_call_operand.hbm [shape: f32[2,4,16,16], index: 0, kind: input, shape index: {}]   ;;  %s54_s1 = inlined_call_operand.hbm [shape: f32[2,4,16,16], index: 1, kind: output, shape index: {}]  }
   0x1   :  { %s10_s8 = sshll.u32 %s53_s0, 4  ;;  %s12_s11 = sshll.u32 %s54_s1, 4  ;;  %s11_s8 = int_to_ptr.hbm [resolvable:$true] %s10_s8  ;;  %s13_s11 = int_to_ptr.hbm [resolvable:$true] %s12_s11 }
   0x2   :  { %s36_s14 = smov 0  }
   0x3   :  { %16 = dma.general %s11_s8, 2048, %s13_s11, %s34_s12, %s35_s13, [#allocation4], %s36_s14, 0  }
   0x4   :  { %32 = dma.done.wait [#allocation2], 2048 }
   0x5   :  { %33 = vsyncadd [#allocation2], 4294965248 }
   0x6   :  { %22 = vsyncmov [#allocation2] }
   0x9   :  { %s23_s15 = vpop.sfrf %22 }
   0xa   :  { %p28_p0 = scmp.ne.s32.totalorder %s23_s15, 0 }
   0xc   :  { %27 = shalt.err (%p28_p0)  }

</bundles_post_ra>
